<compile_context>
chip_gen: v7x
topology: tpu7x:2x2x1
jax: 0.10.0
libtpu: 0.0.40
codegen_flags: <defaults>
</compile_context>

<pallas_src>
import functools

import jax
import jax.numpy as jnp
from jax.experimental import pallas as pl
from jax.experimental.pallas import tpu as pltpu

IN_FEATURES = 50
HIDDEN = 50
OUT_FEATURES = 10


def _round_up(n, m):
    return pl.cdiv(n, m) * m


def _multilenet_o_kernel(x_ref, w1_ref, b1_ref, w2_ref, b2_ref, out_ref):
    # Cast the streamed activation tile to the weights' compute dtype on the
    # VPU (in VMEM); x itself is DMA'd from HBM in its native dtype once.
    x = x_ref[...].astype(w1_ref.dtype)

    # fc1 + relu : MXU matmul (f32 accumulation) + VPU elementwise.
    h = jnp.dot(x, w1_ref[...], preferred_element_type=jnp.float32) + b1_ref[...]
    h = jnp.maximum(h, 0.0)

    # dropout(p=0.5) in eval mode == identity

    # fc2 (feed the MXU in the compute dtype; accumulate in f32).
    logits = (
        jnp.dot(h.astype(w2_ref.dtype), w2_ref[...],
                preferred_element_type=jnp.float32)
        + b2_ref[...]
    )

    # log_softmax along dim=1 (feature axis), f32 throughout.
    m = jnp.max(logits, axis=-1, keepdims=True)
    shifted = logits - m
    lse = jnp.log(jnp.sum(jnp.exp(shifted), axis=-1, keepdims=True))
    out_ref[...] = (shifted - lse).astype(out_ref.dtype)


@functools.partial(jax.jit, static_argnames=("compute_dtype", "block_rows"))
def multilenet_o_forward(x, mask, params, *, compute_dtype=jnp.bfloat16,
                         block_rows=1024):
    """x: [B, 50]. Returns (log_softmax logits [B, 10] f32, mask unchanged)."""
    w1, b1, w2, b2 = params
    B = x.shape[0]

    # Row-tile size: multiple of 8 (sublane), capped so each double-buffered
    # tile stays well under a MiB (fits v5e/v6e/v7x default scoped VMEM).
    tb = int(min(_round_up(block_rows, 8), _round_up(B, 8)))
    b_pad = int(_round_up(B, tb))
    if b_pad != B:
        x = jnp.pad(x, ((0, b_pad - B), (0, 0)))

    # Weights pre-transposed to [in, out] and cast once to the compute dtype
    # (tiny arrays, VMEM-resident across all grid steps).  Biases stay f32
    # (added post f32 accumulation).  x is passed in its native dtype and
    # cast inside the kernel to avoid an extra HBM pass over the big array.
    w1t = w1.T.astype(compute_dtype)                     # [50, 50]
    w2t = w2.T.astype(compute_dtype)                     # [50, 10]
    b1r = b1.reshape(1, -1).astype(jnp.float32)          # [1, 50]
    b2r = b2.reshape(1, -1).astype(jnp.float32)          # [1, 10]

    grid = (b_pad // tb,)
    out = pl.pallas_call(
        _multilenet_o_kernel,
        out_shape=jax.ShapeDtypeStruct((b_pad, OUT_FEATURES), jnp.float32),
        grid=grid,
        in_specs=[
            # x: tiled along the batch axis, pipelined/double-buffered.
            pl.BlockSpec((tb, IN_FEATURES), lambda i: (i, 0)),
            # Weights / biases: same block every step -> stay VMEM-resident.
            pl.BlockSpec((IN_FEATURES, HIDDEN), lambda i: (0, 0)),
            pl.BlockSpec((1, HIDDEN), lambda i: (0, 0)),
            pl.BlockSpec((HIDDEN, OUT_FEATURES), lambda i: (0, 0)),
            pl.BlockSpec((1, OUT_FEATURES), lambda i: (0, 0)),
        ],
        out_specs=pl.BlockSpec((tb, OUT_FEATURES), lambda i: (i, 0)),
        compiler_params=pltpu.CompilerParams(
            dimension_semantics=("parallel",),
        ),
    )(x, w1t, b1r, w2t, b2r)

    if b_pad != B:
        out = out[:B]
    return out, mask


def init_params(key):
    """Deterministic init matching the PyTorch Linear shapes.
    fc1: W [50, 50], b [50];  fc2: W [10, 50], b [10]
    (PyTorch-style uniform(-1/sqrt(fan_in), 1/sqrt(fan_in)))."""
    k1, k2, k3, k4 = jax.random.split(key, 4)
    bound1 = 1.0 / jnp.sqrt(50.0)
    w1 = jax.random.uniform(k1, (HIDDEN, IN_FEATURES), jnp.float32, -bound1, bound1)
    b1 = jax.random.uniform(k2, (HIDDEN,), jnp.float32, -bound1, bound1)
    bound2 = 1.0 / jnp.sqrt(50.0)
    w2 = jax.random.uniform(k3, (OUT_FEATURES, HIDDEN), jnp.float32, -bound2, bound2)
    b2 = jax.random.uniform(k4, (OUT_FEATURES,), jnp.float32, -bound2, bound2)
    return w1, b1, w2, b2


def reference_forward(x, mask, params):
    w1, b1, w2, b2 = params
    h = jnp.maximum(x @ w1.T + b1, 0.0)
    logits = h @ w2.T + b2
    return jax.nn.log_softmax(logits, axis=1), mask


if __name__ == "__main__":
    key = jax.random.PRNGKey(0)
    kx, km, kp, kx2 = jax.random.split(key, 4)
    params = init_params(kp)

    # --- Small-shape test (B=8), f32 compute path: exact numerics. ---
    B = 8
    x = jax.random.normal(kx, (B, IN_FEATURES), jnp.float32)
    mask = jax.random.bernoulli(km, 0.5, (B, HIDDEN)).astype(jnp.float32)

    out_f32, mask_out = multilenet_o_forward(
        x, mask, params, compute_dtype=jnp.float32)
    out_f32 = jax.block_until_ready(out_f32)
    mask_out = jax.block_until_ready(mask_out)

    ref, _ = reference_forward(x, mask, params)
    assert out_f32.shape == (B, OUT_FEATURES)
    assert jnp.allclose(out_f32, ref, atol=1e-5, rtol=1e-5), "f32 mismatch vs reference"
    assert jnp.allclose(mask_out, mask), "mask must pass through unchanged"

    # --- Small-shape test (B=8), default bf16 compute path (loose tol). ---
    out_bf16, _ = multilenet_o_forward(x, mask, params)
    out_bf16 = jax.block_until_ready(out_bf16)
    assert jnp.allclose(out_bf16, ref, atol=3e-2), "bf16 mismatch vs reference"

    # --- Multi-tile grid + padding path (B not a multiple of the tile). ---
    B2 = 200  # forces padding to 256 and a 4-step batch grid with tb=64
    x2 = jax.random.normal(kx2, (B2, IN_FEATURES), jnp.float32)
    mask2 = jnp.ones((B2, HIDDEN), jnp.float32)
    out2, _ = multilenet_o_forward(
        x2, mask2, params, compute_dtype=jnp.float32, block_rows=64)
    out2 = jax.block_until_ready(out2)
    ref2, _ = reference_forward(x2, mask2, params)
    assert out2.shape == (B2, OUT_FEATURES)
    assert jnp.allclose(out2, ref2, atol=1e-5, rtol=1e-5), "tiled/padded mismatch"

    print("KERNEL_OK")
</pallas_src>

<mosaic_0001>
module attributes {stable_mosaic.version = 11 : i64} {
  func.func @_multilenet_o_kernel(%arg0: i32, %arg1: memref<8x50xf32, #tpu.memory_space<vmem>>, %arg2: memref<50x50xf32, #tpu.memory_space<vmem>>, %arg3: memref<1x50xf32, #tpu.memory_space<vmem>>, %arg4: memref<50x10xf32, #tpu.memory_space<vmem>>, %arg5: memref<1x10xf32, #tpu.memory_space<vmem>>, %arg6: memref<8x10xf32, #tpu.memory_space<vmem>>) attributes {dimension_semantics = [#tpu.dimension_semantics<parallel>], iteration_bounds = array<i64: 1>, scalar_prefetch = 0 : i64, scratch_operands = 0 : i64, tpu.core_type = #tpu.core_type<tc>, window_params = [{transform_indices = @transform_0, window_bounds = array<i64: 8, 50>}, {pipeline_mode = #tpu.pipeline_mode<synchronous>, transform_indices = @transform_1, window_bounds = array<i64: 50, 50>}, {pipeline_mode = #tpu.pipeline_mode<synchronous>, transform_indices = @transform_2, window_bounds = array<i64: 1, 50>}, {pipeline_mode = #tpu.pipeline_mode<synchronous>, transform_indices = @transform_3, window_bounds = array<i64: 50, 10>}, {pipeline_mode = #tpu.pipeline_mode<synchronous>, transform_indices = @transform_4, window_bounds = array<i64: 1, 10>}, {transform_indices = @transform_5, window_bounds = array<i64: 8, 10>}]} {
    %c0 = arith.constant 0 : index
    %c0_0 = arith.constant 0 : index
    %0 = vector.load %arg1[%c0, %c0_0] : memref<8x50xf32, #tpu.memory_space<vmem>>, vector<8x50xf32>
    %c0_1 = arith.constant 0 : index
    %c0_2 = arith.constant 0 : index
    %1 = vector.load %arg2[%c0_1, %c0_2] : memref<50x50xf32, #tpu.memory_space<vmem>>, vector<50x50xf32>
    %cst = arith.constant dense<0.000000e+00> : vector<8x50xf32>
    %2 = tpu.matmul %0, %1, %cst {dimension_numbers = #tpu.dot_dimension_numbers<[1], [0], [0], [1], [0, 0, 1, 1], [], []>} : vector<8x50xf32>, vector<50x50xf32>, vector<8x50xf32> -> vector<8x50xf32>
    %c0_3 = arith.constant 0 : index
    %c0_4 = arith.constant 0 : index
    %3 = vector.load %arg3[%c0_3, %c0_4] : memref<1x50xf32, #tpu.memory_space<vmem>>, vector<1x50xf32>
    %4 = vector.broadcast %3 : vector<1x50xf32> to vector<8x50xf32>
    %5 = arith.addf %2, %4 : vector<8x50xf32>
    %cst_5 = arith.constant 0.000000e+00 : f32
    %6 = vector.broadcast %cst_5 : f32 to vector<8x50xf32>
    %7 = arith.maximumf %5, %6 : vector<8x50xf32>
    %c0_6 = arith.constant 0 : index
    %c0_7 = arith.constant 0 : index
    %8 = vector.load %arg4[%c0_6, %c0_7] : memref<50x10xf32, #tpu.memory_space<vmem>>, vector<50x10xf32>
    %cst_8 = arith.constant dense<0.000000e+00> : vector<8x10xf32>
    %9 = tpu.matmul %7, %8, %cst_8 {dimension_numbers = #tpu.dot_dimension_numbers<[1], [0], [0], [1], [0, 0, 1, 1], [], []>} : vector<8x50xf32>, vector<50x10xf32>, vector<8x10xf32> -> vector<8x10xf32>
    %c0_9 = arith.constant 0 : index
    %c0_10 = arith.constant 0 : index
    %10 = vector.load %arg5[%c0_9, %c0_10] : memref<1x10xf32, #tpu.memory_space<vmem>>, vector<1x10xf32>
    %11 = vector.broadcast %10 : vector<1x10xf32> to vector<8x10xf32>
    %12 = arith.addf %9, %11 : vector<8x10xf32>
    %cst_11 = arith.constant dense<0xFF800000> : vector<8xf32>
    %13 = vector.multi_reduction <maximumf>, %12, %cst_11 [1] : vector<8x10xf32> to vector<8xf32>
    %14 = vector.shape_cast %13 : vector<8xf32> to vector<8x1xf32>
    %15 = vector.broadcast %14 : vector<8x1xf32> to vector<8x10xf32>
    %16 = arith.subf %12, %15 : vector<8x10xf32>
    %17 = math.exp %16 : vector<8x10xf32>
    %cst_12 = arith.constant dense<0.000000e+00> : vector<8xf32>
    %18 = vector.multi_reduction <add>, %17, %cst_12 [1] : vector<8x10xf32> to vector<8xf32>
    %19 = vector.shape_cast %18 : vector<8xf32> to vector<8x1xf32>
    %20 = math.log %19 : vector<8x1xf32>
    %21 = vector.broadcast %20 : vector<8x1xf32> to vector<8x10xf32>
    %22 = arith.subf %16, %21 : vector<8x10xf32>
    %c0_13 = arith.constant 0 : index
    %c0_14 = arith.constant 0 : index
    %23 = vector.load %arg6[%c0_13, %c0_14] : memref<8x10xf32, #tpu.memory_space<vmem>>, vector<8x10xf32>
    tpu.vector_store %arg6[%c0_13, %c0_14], %22 {strides = array<i32>} : memref<8x10xf32, #tpu.memory_space<vmem>>, vector<8x10xf32>,
    return
  }
  func.func @transform_0(%arg0: i32) -> (i32, i32) {
    %c0_i32 = arith.constant 0 : i32
    %c0_i32_0 = arith.constant 0 : i32
    return %arg0, %c0_i32 : i32, i32
  }
  func.func @transform_1(%arg0: i32) -> (i32, i32) {
    %c0_i32 = arith.constant 0 : i32
    %c0_i32_0 = arith.constant 0 : i32
    %c0_i32_1 = arith.constant 0 : i32
    return %c0_i32, %c0_i32_0 : i32, i32
  }
  func.func @transform_2(%arg0: i32) -> (i32, i32) {
    %c0_i32 = arith.constant 0 : i32
    %c0_i32_0 = arith.constant 0 : i32
    %c0_i32_1 = arith.constant 0 : i32
    return %c0_i32, %c0_i32_0 : i32, i32
  }
  func.func @transform_3(%arg0: i32) -> (i32, i32) {
    %c0_i32 = arith.constant 0 : i32
    %c0_i32_0 = arith.constant 0 : i32
    %c0_i32_1 = arith.constant 0 : i32
    return %c0_i32, %c0_i32_0 : i32, i32
  }
  func.func @transform_4(%arg0: i32) -> (i32, i32) {
    %c0_i32 = arith.constant 0 : i32
    %c0_i32_0 = arith.constant 0 : i32
    %c0_i32_1 = arith.constant 0 : i32
    return %c0_i32, %c0_i32_0 : i32, i32
  }
  func.func @transform_5(%arg0: i32) -> (i32, i32) {
    %c0_i32 = arith.constant 0 : i32
    %c0_i32_0 = arith.constant 0 : i32
    return %arg0, %c0_i32 : i32, i32
  }
}

</mosaic_0001>

<bundles_post_ra>
// kernel: multilenet_o_forward.1
= control target key start
LH: loop header
LB: loop body
LE: loop exit
PB: predicated region body
PF: predicated region fallthrough
CT: control target
= control target key end

     0   :  { %v339_v3 = vmov 0.0|0.0   ;;  %vm340_vm0 = vmmov 0   ;;  %v341_v6 = vmov 0.0   ;;  %s439_s0 = inlined_call_operand.vmem [shape: f32[8,50], index: 0, kind: input, shape index: {}]   ;;  %s440_s1 = inlined_call_operand.vmem [shape: f32[50,50], index: 1, kind: input, shape index: {}]   ;;  %s441_s2 = inlined_call_operand.vmem [shape: f32[1,50], index: 2, kind: input, shape index: {}]   ;;  %s442_s3 = inlined_call_operand.vmem [shape: f32[50,10], index: 3, kind: input, shape index: {}]   ;;  %s443_s4 = inlined_call_operand.vmem [shape: f32[1,10], index: 4, kind: input, shape index: {}]   ;;  %s444_s5 = inlined_call_operand.hbm [shape: f32[8,10], index: 5, kind: output, shape index: {}]  }
   0x1   :  { %v22_v0 = vld [vmem:[%s440_s1] sm:$0xff]  ;;  %v23_v1 = vld [vmem:[%s440_s1 + $0x8] sm:$0xff]  ;;  %v24_v2 = vld [vmem:[%s440_s1 + $0x10] sm:$0xff]  ;;  %289 = vmatprep.subr.bf16.mxu0 %v339_v3  ;;  %298 = vmatprep.subr.bf16.mxu1 %v339_v3 }
   0x2   :  { %v290_v4 = vpack.c.bf16 %v23_v1, %v22_v0  ;;  %v25_v5 = vld [vmem:[%s440_s1 + $0x18] sm:$0xff]  ;;  %269 = vmatprep.mubr.msk.f32.mxu0 %vm340_vm0, %v341_v6  ;;  %v115_v7 = vld [vmem:[%s442_s3] sm:$0xff]  ;;  %286 = vmatprep.mubr.msk.f32.mxu1 %vm340_vm0, %v341_v6  ;;  %v116_v9 = vld [vmem:[%s442_s3 + $0x8] sm:$0xff] }
   0x3   :  { %v293_v8 = vpack.c.bf16 %v25_v5, %v24_v2  ;;  %v117_v10 = vld [vmem:[%s442_s3 + $0x10] sm:$0xff]  ;;  %v118_v11 = vld [vmem:[%s442_s3 + $0x18] sm:$0xff]  ;;  %v26_v12 = vld [vmem:[%s440_s1 + $0x20] sm:$0xff]  ;;  %v299_v14 = vpack.c.bf16 %v116_v9, %v115_v7 }
   0x4   :  { %291 = vmatpush3.bf16.msra.mxu0 %v290_v4  ;;  %v27_v13 = vld [vmem:[%s440_s1 + $0x28] sm:$0xff] }
   0x5   :  { %292 = vmatprep.subr.bf16.mxu0 %v339_v3 }
   0x6   :  { %10 = vsyncpa [#allocation3], 0  ;;  %300 = vmatpush3.bf16.msra.mxu1 %v299_v14  ;;  %v302_v15 = vpack.c.bf16 %v118_v11, %v117_v10  ;;  %v296_v16 = vpack.c.bf16 %v27_v13, %v26_v12  ;;  %v28_v17 = vld [vmem:[%s440_s1 + $0x30] sm:$0x3]  ;;  %vm40_vm1 = vcmask 1041408   ;;  %v21_v18 = vld [vmem:[%s439_s0] sm:$0xff] }
   0x7   :  { %301 = vmatprep.subr.bf16.mxu1 %v339_v3  ;;  %vm36_vm2 = vcmask 408576   ;;  %v119_v19 = vld [vmem:[%s442_s3 + $0x20] sm:$0xff]  ;;  %v120_v20 = vld [vmem:[%s442_s3 + $0x28] sm:$0xff]  ;;  %v121_v22 = vld [vmem:[%s442_s3 + $0x30] sm:$0x3]  ;;  %vm205_vm3 = vcmask 80896  }
   0x8   :  { %294 = vmatpush3.bf16.msra.mxu0 %v293_v8  ;;  %v305_v21 = vpack.c.bf16 %v120_v20, %v119_v19  ;;  %v233_v23 = vld [vmem:[%s441_s2] ss:$0 sm:$0xff]  ;;  %s342_s2 = smov [#allocation2]  }
   0x9   :  { %295 = vmatprep.subr.bf16.mxu0 %v339_v3  ;;  %v236_v28 = vld [vmem:[%s443_s4] ss:$0 sm:$0xff]  ;;  %s225_s3 = sshll.u32 %s342_s2, 4  ;;  %s226_s3 = int_to_ptr.vmem [resolvable:$true] %s225_s3 }
   0xa   :  { %303 = vmatpush3.bf16.msra.mxu1 %v302_v15  ;;  %s315_s4 = scalar_lea.vmem %s226_s3, 128  ;;  %p320_p1 = scmp.lt.s32.totalorder %s226_s3, %s226_s3 }
   0xb   :  { %304 = vmatprep.subr.bf16.mxu1 %v339_v3  ;;  %p316_p0 = scmp.ne.s32.totalorder %s226_s3, %s315_s4  ;;  %p321_p2 = scmp.lt.s32.totalorder %s315_s4, %s315_s4 }
   0xc   :  { %297 = vmatpush3.bf16.msra.mxu0 %v296_v16 }
   0xd   :  { %267 = vmatprep.subr.mxu0 %v341_v6  ;;  %p322_p3 = por %p321_p2, %p320_p1 }
   0xe   :  { %306 = vmatpush3.bf16.msra.mxu1 %v305_v21 }
   0xf   :  { %284 = vmatprep.subr.mxu1 %v341_v6  ;;  %p323_p4 = pnand %p322_p3, %p316_p0 }
  0x10   :  { %268 = vmatpush3.msk.msra.mxu0 %vm40_vm1, %v28_v17 }
  0x11   :  { %270 = vmatmul.mubr.msk.f32.vlgmr.msra.gmra.mrb[0].mxu0 %vm36_vm2, %v21_v18 }
  0x12   :  { %285 = vmatpush3.msk.msra.mxu1 %vm40_vm1, %v121_v22 }
  0xe4   :  { %v110_v24 = vpop.f32.mrb[0].mxu0 }
  0xe5   :  { %v111_v25 = vadd.f32 %v233_v23, %v110_v24  ;;  %v271_v26 = vpop.f32.mrb[1].mxu0 }
  0xe7   :  { %v114_v27 = vmax.f32 %v111_v25, 0.0 }
  0xe9   :  { %287 = vmatmul.mubr.msk.f32.vlgmr.msra.gmra.mrb[0].mxu1 %vm36_vm2, %v114_v27 }
 0x1bc   :  { %v201_v29 = vpop.f32.mrb[0].mxu1 }
 0x1bd   :  { %v202_v30 = vadd.f32 %v236_v28, %v201_v29  ;;  %v288_v31 = vpop.f32.mrb[1].mxu1 }
 0x1bf   :  { %v206_v32 = vsel %vm205_vm3, %v202_v30, -inf }
 0x1c0   :  { %207 = vmax.xlane.f32.xlu0 %v206_v32 }
 0x24d   :  { %v208_v33 = vpop.xlane.xlu0 %207 }
 0x24e   :  { %v209_v34 = vsub.f32 %v202_v30, %v208_v33 }
 0x250   :  { %v210_v35 = vmul.f32 1.442695, %v209_v34 }
 0x252   :  { %311 = vpow2.f32 %v210_v35 }
 0x25c   :  { %v312_v36 = vpop.eup %311 }
 0x25d   :  { %v212_v37 = vsel %vm205_vm3, %v312_v36, 0.0 }
 0x25e   :  { %213 = vadd.xlane.f32.xlu0 %v212_v37 }
 0x2eb   :  { %v214_v38 = vpop.xlane.xlu0 %213 }
 0x2ec   :  { %313 = vlog2.f32 %v214_v38 }
 0x2f6   :  { %v314_v39 = vpop.eup %313 }
 0x2f7   :  { %v216_v40 = vmul.f32 0.6931472, %v314_v39 }
 0x2f9   :  { %v217_v41 = vsub.f32 %v209_v34, %v216_v40 }
 0x2fb   :  { %218 = vst.msk [vmem:[#allocation2] sm:$0xff] %vm205_vm3, %v217_v41 }
 0x2fc   :  { %326 = shalt.err (!%p323_p4)
}
 0x2fd   :  { %s327_s27 = scalar_lea.hbm %s444_s5, 128 }
 0x2fe   :  { %p328_p5 = scmp.ne.s32.totalorder %s444_s5, %s327_s27  ;;  %p331_p6 = scmp.lt.u32.totalorder %s327_s27, %s444_s5 }
 0x300   :  { %p333_p7 = pnand %p331_p6, %p328_p5 }
 0x302   :  { %336 = shalt.err (!%p333_p7)
}
 0x303   :  { %228 = dma.vmem_to_hbm [thread:$0]  %s226_s3, 128, %s444_s5, [#allocation3]  }
 0x304   :  { %337 = dma.done.wait [#allocation3], 128  }
 0x305   :  { %338 = vsyncadd [#allocation3], 4294967168 }
 0x306   :  { %232 = vsyncpa [#allocation3], 1 }

</bundles_post_ra>
